<compile_context>
chip_gen: v7x
topology: tpu7x:2x2x1
jax: 0.10.0
libtpu: 0.0.40
codegen_flags: <defaults>
</compile_context>

<pallas_src>
import numpy as np

import jax
import jax.numpy as jnp
from jax.experimental import pallas as pl
from jax.experimental.pallas import tpu as pltpu


def _round_up(x, m):
    return (x + m - 1) // m * m


# -----------------------------------------------------------------------------
# Kernel 1: multi-layer LSTM over the full (padded) sequence.
#   Gridless pallas_call; the T+1 time loop runs inside the kernel (pl.loop).
#   h/c states for every layer live in f32 VMEM scratch.
# -----------------------------------------------------------------------------
def make_lstm_kernel(num_layers, seq_len, hp):
    def kernel(x_ref, *rest):
        # rest layout: [w_fused_0, bias_0, ..., w_fused_{L-1}, bias_{L-1},
        #               out_ref, h_scr, c_scr]
        wb_refs = rest[: 2 * num_layers]
        out_ref = rest[2 * num_layers]          # (T1, Bp, Hp) bf16
        h_scr = rest[2 * num_layers + 1]        # (L, Bp, Hp) f32
        c_scr = rest[2 * num_layers + 2]        # (L, Bp, Hp) f32

        h_scr[...] = jnp.zeros_like(h_scr)
        c_scr[...] = jnp.zeros_like(c_scr)

        @pl.loop(0, seq_len)
        def _(t):
            inp = x_ref[t]                                          # (Bp, Ep/Hp) bf16
            for l in range(num_layers):
                w = wb_refs[2 * l][...]                             # (in_p+Hp, 4Hp) bf16
                b = wb_refs[2 * l + 1][...]                         # (Bp, 4Hp) f32 (pre-broadcast)
                h_prev = c_prev = None
                h_prev = h_scr[l]                                   # (Bp, Hp) f32
                c_prev = c_scr[l]                                   # (Bp, Hp) f32

                # Fused input/hidden matmul: one MXU push per layer per step.
                xh = jnp.concatenate([inp, h_prev.astype(inp.dtype)], axis=-1)
                gates = jnp.dot(xh, w, preferred_element_type=jnp.float32) + b

                # PyTorch gate order i, f, g, o — each a whole 128-lane block.
                i_g = jax.nn.sigmoid(gates[:, 0 * hp:1 * hp])
                f_g = jax.nn.sigmoid(gates[:, 1 * hp:2 * hp])
                g_g = jnp.tanh(gates[:, 2 * hp:3 * hp])
                o_g = jax.nn.sigmoid(gates[:, 3 * hp:4 * hp])

                c_new = f_g * c_prev + i_g * g_g
                h_new = o_g * jnp.tanh(c_new)

                h_scr[l] = h_new
                c_scr[l] = c_new
                inp = h_new.astype(inp.dtype)                       # feed next layer (bf16)

            out_ref[t] = inp                                        # top-layer hidden

    return kernel


def lstm_forward_pallas(x_tm, layers):
    """x_tm: (T1, Bp, Ep) bf16 time-major.  layers: [(w_fused, bias_bcast), ...].
    Returns (T1, Bp, Hp) top-layer hiddens in bf16."""
    T1, Bp, _ = x_tm.shape
    num_layers = len(layers)
    Hp = layers[0][0].shape[1] // 4

    kernel = make_lstm_kernel(num_layers, T1, Hp)
    flat = [a for pair in layers for a in pair]

    return pl.pallas_call(
        kernel,
        out_shape=jax.ShapeDtypeStruct((T1, Bp, Hp), jnp.bfloat16),
        scratch_shapes=[
            pltpu.VMEM((num_layers, Bp, Hp), jnp.float32),   # h state
            pltpu.VMEM((num_layers, Bp, Hp), jnp.float32),   # c state
        ],
    )(x_tm, *flat)


# -----------------------------------------------------------------------------
# Kernel 2: final vocab projection  out = packed_h @ W + b, tiled over (N, V).
# -----------------------------------------------------------------------------
def linear_kernel(x_ref, w_ref, b_ref, o_ref):
    o_ref[...] = (jnp.dot(x_ref[...], w_ref[...],
                          preferred_element_type=jnp.float32)
                  + b_ref[...]).astype(o_ref.dtype)


def linear_pallas(x, w, b, *, tm=256, tn=1024):
    """x: (N, K) bf16, w: (K, V) bf16, b: (1, V) f32 -> (N, V) f32."""
    N, K = x.shape
    V = w.shape[1]

    tm = min(tm, _round_up(N, 8))
    tn = min(tn, _round_up(V, 128))
    Np = _round_up(N, tm)
    Vp = _round_up(V, tn)

    x_p = x if Np == N else jnp.zeros((Np, K), x.dtype).at[:N].set(x)
    w_p = w if Vp == V else jnp.zeros((K, Vp), w.dtype).at[:, :V].set(w)
    b_p = b if Vp == V else jnp.zeros((1, Vp), b.dtype).at[:, :V].set(b)

    out = pl.pallas_call(
        linear_kernel,
        out_shape=jax.ShapeDtypeStruct((Np, Vp), jnp.float32),
        grid=(Np // tm, Vp // tn),
        in_specs=[pl.BlockSpec((tm, K), lambda i, j: (i, 0)),
                  pl.BlockSpec((K, tn), lambda i, j: (0, j)),
                  pl.BlockSpec((1, tn), lambda i, j: (0, j))],
        out_specs=pl.BlockSpec((tm, tn), lambda i, j: (i, j)),
        compiler_params=pltpu.CompilerParams(
            dimension_semantics=("parallel", "parallel"),
            vmem_limit_bytes=48 * 1024 * 1024),
    )(x_p, w_p, b_p)
    # TODO(synk): emit bf16 here if the downstream loss accepts it (halves the
    # largest HBM writeback of the forward pass).
    return out[:N, :V]


# -----------------------------------------------------------------------------
# DecoderRNN forward (embedding / packing indices are plain-JAX glue).
# -----------------------------------------------------------------------------
def decoder_rnn_forward(params, features, captions, lengths):
    """features: (B, E) f32, captions: (B, T) int32,
    lengths: python list, sorted descending, each <= T+1.
    Returns (sum(lengths), vocab_size) f32 in pack_padded_sequence order."""
    embed_table = params["embed"]               # (V, E)
    H = params["hidden_size"]
    B, T = captions.shape
    E = embed_table.shape[1]
    V = params["linear_w"].shape[1]
    T1 = T + 1

    Ep = _round_up(E, 128)    # lane-align embedding dim
    Hp = _round_up(H, 128)    # lane-align hidden dim (padded dims stay exactly 0)
    Bp = _round_up(B, 8)      # sublane-align batch

    # Embedding lookup + prepend features, pad, go time-major bf16.
    emb = jnp.take(embed_table, captions, axis=0)                   # (B, T, E)
    x_bf = jnp.concatenate([features[:, None, :], emb], axis=1)     # (B, T1, E)
    x_pad = jnp.zeros((Bp, T1, Ep), jnp.float32).at[:B, :, :E].set(x_bf)
    x_tm = jnp.transpose(x_pad, (1, 0, 2)).astype(jnp.bfloat16)     # (T1, Bp, Ep)

    # Fuse + lane-pad LSTM weights ONCE: stacked [[W_ih],[W_hh]] per layer,
    # bias pre-broadcast over the batch sublanes.
    layers = []
    for l, (w_ih, w_hh, b) in enumerate(params["lstm"]):
        in_dim = w_ih.shape[0]
        in_p = Ep if l == 0 else Hp
        fused = jnp.zeros((in_p + Hp, 4 * Hp), jnp.float32)
        bias = jnp.zeros((Bp, 4 * Hp), jnp.float32)
        for g in range(4):                      # gate order i, f, g, o
            fused = fused.at[:in_dim, g * Hp:g * Hp + H].set(
                w_ih[:, g * H:(g + 1) * H])
            fused = fused.at[in_p:in_p + H, g * Hp:g * Hp + H].set(
                w_hh[:, g * H:(g + 1) * H])
            bias = bias.at[:, g * Hp:g * Hp + H].set(
                jnp.broadcast_to(b[:, g * H:(g + 1) * H], (Bp, H)))
        layers.append((fused.astype(jnp.bfloat16), bias))

    # LSTM over the full padded sequence (causal => identical to packed run
    # at every valid (t, b) position).
    hiddens_tm = lstm_forward_pallas(x_tm, layers)                  # (T1, Bp, Hp) bf16

    # pack_padded_sequence ordering: for t in 0..max_len-1, emit rows b with
    # lengths[b] > t.  (lengths are host Python -> baked into the trace.)
    t_idx, b_idx = [], []
    for t in range(max(lengths)):
        for bi in range(len(lengths)):
            if lengths[bi] > t:
                t_idx.append(t)
                b_idx.append(bi)
    t_idx = jnp.asarray(np.array(t_idx, dtype=np.int32))
    b_idx = jnp.asarray(np.array(b_idx, dtype=np.int32))
    packed_h = hiddens_tm[t_idx, b_idx]                             # (N, Hp) bf16

    # Final vocab projection (tiled Pallas matmul).  Linear weight rows padded
    # to Hp (padded hidden dims are exactly 0 so zero rows are exact).
    w_lin = (jnp.zeros((Hp, V), jnp.float32)
             .at[:H].set(params["linear_w"]).astype(jnp.bfloat16))
    return linear_pallas(packed_h, w_lin, params["linear_b"])


# -----------------------------------------------------------------------------
# Pure-JAX f32 reference (module semantics) for the correctness check.
# -----------------------------------------------------------------------------
def reference_forward(params, features, captions, lengths):
    embed_table = params["embed"]
    H = params["hidden_size"]
    emb = jnp.take(embed_table, captions, axis=0)
    x = jnp.concatenate([features[:, None, :], emb], axis=1)        # (B, T+1, E)
    B, T1, _ = x.shape

    layer_in = x
    for (w_ih, w_hh, b) in params["lstm"]:
        h = jnp.zeros((B, H), jnp.float32)
        c = jnp.zeros((B, H), jnp.float32)
        outs = []
        for t in range(T1):
            gates = layer_in[:, t, :] @ w_ih + h @ w_hh + b
            i_g = jax.nn.sigmoid(gates[:, 0 * H:1 * H])
            f_g = jax.nn.sigmoid(gates[:, 1 * H:2 * H])
            g_g = jnp.tanh(gates[:, 2 * H:3 * H])
            o_g = jax.nn.sigmoid(gates[:, 3 * H:4 * H])
            c = f_g * c + i_g * g_g
            h = o_g * jnp.tanh(c)
            outs.append(h)
        layer_in = jnp.stack(outs, axis=1)                          # (B, T+1, H)

    rows = []
    for t in range(max(lengths)):
        for bi in range(len(lengths)):
            if lengths[bi] > t:
                rows.append(layer_in[bi, t, :])
    packed_h = jnp.stack(rows, axis=0)
    return packed_h @ params["linear_w"] + params["linear_b"]


# -----------------------------------------------------------------------------
# Deterministic parameter construction (synthetic, not a checkpoint).
# -----------------------------------------------------------------------------
def init_params(key, embed_size, hidden_size, vocab_size, num_layers):
    keys = jax.random.split(key, 3 + 6 * num_layers)
    k = iter(keys)
    scale = 0.1
    params = {
        "hidden_size": hidden_size,
        "embed": scale * jax.random.normal(next(k), (vocab_size, embed_size),
                                           jnp.float32),
        "linear_w": scale * jax.random.normal(next(k),
                                              (hidden_size, vocab_size),
                                              jnp.float32),
        "linear_b": scale * jax.random.normal(next(k), (1, vocab_size),
                                              jnp.float32),
        "lstm": [],
    }
    for l in range(num_layers):
        in_dim = embed_size if l == 0 else hidden_size
        w_ih = scale * jax.random.normal(next(k), (in_dim, 4 * hidden_size),
                                         jnp.float32)
        w_hh = scale * jax.random.normal(next(k), (hidden_size, 4 * hidden_size),
                                         jnp.float32)
        b_ih = scale * jax.random.normal(next(k), (1, 4 * hidden_size),
                                         jnp.float32)
        b_hh = scale * jax.random.normal(next(k), (1, 4 * hidden_size),
                                         jnp.float32)
        params["lstm"].append((w_ih, w_hh, b_ih + b_hh))  # combine biases
    return params


if __name__ == "__main__":
    # Small, module-consistent shapes.
    B, T = 2, 8
    embed_size = 32
    hidden_size = 32
    vocab_size = 64
    num_layers = 2
    lengths = [9, 7]          # sorted descending, <= T + 1 (pack requirement)

    key = jax.random.PRNGKey(0)
    kp, kf, kc = jax.random.split(key, 3)
    params = init_params(kp, embed_size, hidden_size, vocab_size, num_layers)

    features = jax.random.normal(kf, (B, embed_size), jnp.float32)
    captions = jax.random.randint(kc, (B, T), 0, vocab_size, jnp.int32)

    out = decoder_rnn_forward(params, features, captions, lengths)
    out = jax.block_until_ready(out)

    ref = reference_forward(params, features, captions, lengths)
    assert out.shape == (sum(lengths), vocab_size), out.shape
    # Tolerance reflects bf16 MXU inputs (f32 accumulation / f32 cell state)
    # vs. the pure-f32 reference; observed error is O(1e-3).
    np.testing.assert_allclose(np.asarray(out), np.asarray(ref),
                               rtol=2e-2, atol=2e-2)

    print("KERNEL_OK")
</pallas_src>

<mosaic_0001>
module attributes {stable_mosaic.version = 11 : i64} {
  func.func @kernel(%arg0: memref<9x8x128xbf16, #tpu.memory_space<vmem>>, %arg1: memref<256x512xbf16, #tpu.memory_space<vmem>>, %arg2: memref<8x512xf32, #tpu.memory_space<vmem>>, %arg3: memref<256x512xbf16, #tpu.memory_space<vmem>>, %arg4: memref<8x512xf32, #tpu.memory_space<vmem>>, %arg5: memref<9x8x128xbf16, #tpu.memory_space<vmem>>, %arg6: memref<2x8x128xf32, #tpu.memory_space<vmem>>, %arg7: memref<2x8x128xf32, #tpu.memory_space<vmem>>) attributes {dimension_semantics = [], scalar_prefetch = 0 : i64, scratch_operands = 2 : i64, tpu.core_type = #tpu.core_type<tc>} {
    %cst = arith.constant 0.000000e+00 : f32
    %0 = vector.broadcast %cst : f32 to vector<2x8x128xf32>
    %c0 = arith.constant 0 : index
    %c0_0 = arith.constant 0 : index
    %c0_1 = arith.constant 0 : index
    %1 = vector.load %arg6[%c0, %c0_0, %c0_1] : memref<2x8x128xf32, #tpu.memory_space<vmem>>, vector<2x8x128xf32>
    tpu.vector_store %arg6[%c0, %c0_0, %c0_1], %0 {strides = array<i32>} : memref<2x8x128xf32, #tpu.memory_space<vmem>>, vector<2x8x128xf32>,
    %cst_2 = arith.constant 0.000000e+00 : f32
    %2 = vector.broadcast %cst_2 : f32 to vector<2x8x128xf32>
    %c0_3 = arith.constant 0 : index
    %c0_4 = arith.constant 0 : index
    %c0_5 = arith.constant 0 : index
    %3 = vector.load %arg7[%c0_3, %c0_4, %c0_5] : memref<2x8x128xf32, #tpu.memory_space<vmem>>, vector<2x8x128xf32>
    tpu.vector_store %arg7[%c0_3, %c0_4, %c0_5], %2 {strides = array<i32>} : memref<2x8x128xf32, #tpu.memory_space<vmem>>, vector<2x8x128xf32>,
    %c0_i32 = arith.constant 0 : i32
    %c9_i32 = arith.constant 9 : i32
    %4 = arith.addi %c0_i32, %c9_i32 : i32
    %c1_i32 = arith.constant 1 : i32
    scf.for %arg8 = %c0_i32 to %4 step %c1_i32  : i32 {
      %c1_i32_7 = arith.constant 1 : i32
      %5 = arith.muli %arg8, %c1_i32_7 : i32
      %c0_i32_8 = arith.constant 0 : i32
      %6 = arith.addi %c0_i32_8, %5 : i32
      %7 = arith.index_cast %6 : i32 to index
      %c0_9 = arith.constant 0 : index
      %c0_10 = arith.constant 0 : index
      %8 = vector.load %arg0[%7, %c0_9, %c0_10] : memref<9x8x128xbf16, #tpu.memory_space<vmem>>, vector<1x8x128xbf16>
      %9 = vector.shape_cast %8 : vector<1x8x128xbf16> to vector<8x128xbf16>
      %c0_11 = arith.constant 0 : index
      %c0_12 = arith.constant 0 : index
      %10 = vector.load %arg1[%c0_11, %c0_12] : memref<256x512xbf16, #tpu.memory_space<vmem>>, vector<256x512xbf16>
      %c0_13 = arith.constant 0 : index
      %c0_14 = arith.constant 0 : index
      %11 = vector.load %arg2[%c0_13, %c0_14] : memref<8x512xf32, #tpu.memory_space<vmem>>, vector<8x512xf32>
      %c0_15 = arith.constant 0 : index
      %c0_16 = arith.constant 0 : index
      %c0_17 = arith.constant 0 : index
      %12 = vector.load %arg6[%c0_15, %c0_16, %c0_17] : memref<2x8x128xf32, #tpu.memory_space<vmem>>, vector<1x8x128xf32>
      %13 = vector.shape_cast %12 : vector<1x8x128xf32> to vector<8x128xf32>
      %c0_18 = arith.constant 0 : index
      %c0_19 = arith.constant 0 : index
      %c0_20 = arith.constant 0 : index
      %14 = vector.load %arg7[%c0_18, %c0_19, %c0_20] : memref<2x8x128xf32, #tpu.memory_space<vmem>>, vector<1x8x128xf32>
      %15 = vector.shape_cast %14 : vector<1x8x128xf32> to vector<8x128xf32>
      %16 = arith.truncf %13 : vector<8x128xf32> to vector<8x128xbf16>
      %17 = tpu.concatenate %9, %16 in 1 : vector<8x128xbf16>, vector<8x128xbf16> -> vector<8x256xbf16>
      %cst_21 = arith.constant dense<0.000000e+00> : vector<8x512xf32>
      %18 = tpu.matmul %17, %10, %cst_21 {dimension_numbers = #tpu.dot_dimension_numbers<[1], [0], [0], [1], [0, 0, 1, 1], [], []>} : vector<8x256xbf16>, vector<256x512xbf16>, vector<8x512xf32> -> vector<8x512xf32>
      %19 = arith.addf %18, %11 : vector<8x512xf32>
      %20 = vector.extract_strided_slice %19 {offsets = [0, 0], sizes = [8, 128], strides = [1, 1]} : vector<8x512xf32> to vector<8x128xf32>
      %21 = arith.negf %20 : vector<8x128xf32>
      %22 = math.exp %21 : vector<8x128xf32>
      %cst_22 = arith.constant 1.000000e+00 : f32
      %23 = vector.broadcast %cst_22 : f32 to vector<8x128xf32>
      %24 = arith.addf %23, %22 : vector<8x128xf32>
      %25 = arith.divf %23, %24 : vector<8x128xf32>
      %26 = vector.extract_strided_slice %19 {offsets = [0, 128], sizes = [8, 128], strides = [1, 1]} : vector<8x512xf32> to vector<8x128xf32>
      %27 = arith.negf %26 : vector<8x128xf32>
      %28 = math.exp %27 : vector<8x128xf32>
      %cst_23 = arith.constant 1.000000e+00 : f32
      %29 = vector.broadcast %cst_23 : f32 to vector<8x128xf32>
      %30 = arith.addf %29, %28 : vector<8x128xf32>
      %31 = arith.divf %29, %30 : vector<8x128xf32>
      %32 = vector.extract_strided_slice %19 {offsets = [0, 256], sizes = [8, 128], strides = [1, 1]} : vector<8x512xf32> to vector<8x128xf32>
      %33 = math.tanh %32 : vector<8x128xf32>
      %34 = vector.extract_strided_slice %19 {offsets = [0, 384], sizes = [8, 128], strides = [1, 1]} : vector<8x512xf32> to vector<8x128xf32>
      %35 = arith.negf %34 : vector<8x128xf32>
      %36 = math.exp %35 : vector<8x128xf32>
      %cst_24 = arith.constant 1.000000e+00 : f32
      %37 = vector.broadcast %cst_24 : f32 to vector<8x128xf32>
      %38 = arith.addf %37, %36 : vector<8x128xf32>
      %39 = arith.divf %37, %38 : vector<8x128xf32>
      %40 = arith.mulf %31, %15 : vector<8x128xf32>
      %41 = arith.mulf %25, %33 : vector<8x128xf32>
      %42 = arith.addf %40, %41 : vector<8x128xf32>
      %43 = math.tanh %42 : vector<8x128xf32>
      %44 = arith.mulf %39, %43 : vector<8x128xf32>
      %c0_25 = arith.constant 0 : index
      %c0_26 = arith.constant 0 : index
      %c0_27 = arith.constant 0 : index
      %45 = vector.load %arg6[%c0_25, %c0_26, %c0_27] : memref<2x8x128xf32, #tpu.memory_space<vmem>>, vector<1x8x128xf32>
      %46 = vector.shape_cast %45 : vector<1x8x128xf32> to vector<8x128xf32>
      %47 = vector.shape_cast %44 : vector<8x128xf32> to vector<1x8x128xf32>
      tpu.vector_store %arg6[%c0_25, %c0_26, %c0_27], %47 {strides = array<i32>} : memref<2x8x128xf32, #tpu.memory_space<vmem>>, vector<1x8x128xf32>,
      %c0_28 = arith.constant 0 : index
      %c0_29 = arith.constant 0 : index
      %c0_30 = arith.constant 0 : index
      %48 = vector.load %arg7[%c0_28, %c0_29, %c0_30] : memref<2x8x128xf32, #tpu.memory_space<vmem>>, vector<1x8x128xf32>
      %49 = vector.shape_cast %48 : vector<1x8x128xf32> to vector<8x128xf32>
      %50 = vector.shape_cast %42 : vector<8x128xf32> to vector<1x8x128xf32>
      tpu.vector_store %arg7[%c0_28, %c0_29, %c0_30], %50 {strides = array<i32>} : memref<2x8x128xf32, #tpu.memory_space<vmem>>, vector<1x8x128xf32>,
      %51 = arith.truncf %44 : vector<8x128xf32> to vector<8x128xbf16>
      %c0_31 = arith.constant 0 : index
      %c0_32 = arith.constant 0 : index
      %52 = vector.load %arg3[%c0_31, %c0_32] : memref<256x512xbf16, #tpu.memory_space<vmem>>, vector<256x512xbf16>
      %c0_33 = arith.constant 0 : index
      %c0_34 = arith.constant 0 : index
      %53 = vector.load %arg4[%c0_33, %c0_34] : memref<8x512xf32, #tpu.memory_space<vmem>>, vector<8x512xf32>
      %c1 = arith.constant 1 : index
      %c0_35 = arith.constant 0 : index
      %c0_36 = arith.constant 0 : index
      %54 = vector.load %arg6[%c1, %c0_35, %c0_36] : memref<2x8x128xf32, #tpu.memory_space<vmem>>, vector<1x8x128xf32>
      %55 = vector.shape_cast %54 : vector<1x8x128xf32> to vector<8x128xf32>
      %c1_37 = arith.constant 1 : index
      %c0_38 = arith.constant 0 : index
      %c0_39 = arith.constant 0 : index
      %56 = vector.load %arg7[%c1_37, %c0_38, %c0_39] : memref<2x8x128xf32, #tpu.memory_space<vmem>>, vector<1x8x128xf32>
      %57 = vector.shape_cast %56 : vector<1x8x128xf32> to vector<8x128xf32>
      %58 = arith.truncf %55 : vector<8x128xf32> to vector<8x128xbf16>
      %59 = tpu.concatenate %51, %58 in 1 : vector<8x128xbf16>, vector<8x128xbf16> -> vector<8x256xbf16>
      %cst_40 = arith.constant dense<0.000000e+00> : vector<8x512xf32>
      %60 = tpu.matmul %59, %52, %cst_40 {dimension_numbers = #tpu.dot_dimension_numbers<[1], [0], [0], [1], [0, 0, 1, 1], [], []>} : vector<8x256xbf16>, vector<256x512xbf16>, vector<8x512xf32> -> vector<8x512xf32>
      %61 = arith.addf %60, %53 : vector<8x512xf32>
      %62 = vector.extract_strided_slice %61 {offsets = [0, 0], sizes = [8, 128], strides = [1, 1]} : vector<8x512xf32> to vector<8x128xf32>
      %63 = arith.negf %62 : vector<8x128xf32>
      %64 = math.exp %63 : vector<8x128xf32>
      %cst_41 = arith.constant 1.000000e+00 : f32
      %65 = vector.broadcast %cst_41 : f32 to vector<8x128xf32>
      %66 = arith.addf %65, %64 : vector<8x128xf32>
      %67 = arith.divf %65, %66 : vector<8x128xf32>
      %68 = vector.extract_strided_slice %61 {offsets = [0, 128], sizes = [8, 128], strides = [1, 1]} : vector<8x512xf32> to vector<8x128xf32>
      %69 = arith.negf %68 : vector<8x128xf32>
      %70 = math.exp %69 : vector<8x128xf32>
      %cst_42 = arith.constant 1.000000e+00 : f32
      %71 = vector.broadcast %cst_42 : f32 to vector<8x128xf32>
      %72 = arith.addf %71, %70 : vector<8x128xf32>
      %73 = arith.divf %71, %72 : vector<8x128xf32>
      %74 = vector.extract_strided_slice %61 {offsets = [0, 256], sizes = [8, 128], strides = [1, 1]} : vector<8x512xf32> to vector<8x128xf32>
      %75 = math.tanh %74 : vector<8x128xf32>
      %76 = vector.extract_strided_slice %61 {offsets = [0, 384], sizes = [8, 128], strides = [1, 1]} : vector<8x512xf32> to vector<8x128xf32>
      %77 = arith.negf %76 : vector<8x128xf32>
      %78 = math.exp %77 : vector<8x128xf32>
      %cst_43 = arith.constant 1.000000e+00 : f32
      %79 = vector.broadcast %cst_43 : f32 to vector<8x128xf32>
      %80 = arith.addf %79, %78 : vector<8x128xf32>
      %81 = arith.divf %79, %80 : vector<8x128xf32>
      %82 = arith.mulf %73, %57 : vector<8x128xf32>
      %83 = arith.mulf %67, %75 : vector<8x128xf32>
      %84 = arith.addf %82, %83 : vector<8x128xf32>
      %85 = math.tanh %84 : vector<8x128xf32>
      %86 = arith.mulf %81, %85 : vector<8x128xf32>
      %c1_44 = arith.constant 1 : index
      %c0_45 = arith.constant 0 : index
      %c0_46 = arith.constant 0 : index
      %87 = vector.load %arg6[%c1_44, %c0_45, %c0_46] : memref<2x8x128xf32, #tpu.memory_space<vmem>>, vector<1x8x128xf32>
      %88 = vector.shape_cast %87 : vector<1x8x128xf32> to vector<8x128xf32>
      %89 = vector.shape_cast %86 : vector<8x128xf32> to vector<1x8x128xf32>
      tpu.vector_store %arg6[%c1_44, %c0_45, %c0_46], %89 {strides = array<i32>} : memref<2x8x128xf32, #tpu.memory_space<vmem>>, vector<1x8x128xf32>,
      %c1_47 = arith.constant 1 : index
      %c0_48 = arith.constant 0 : index
      %c0_49 = arith.constant 0 : index
      %90 = vector.load %arg7[%c1_47, %c0_48, %c0_49] : memref<2x8x128xf32, #tpu.memory_space<vmem>>, vector<1x8x128xf32>
      %91 = vector.shape_cast %90 : vector<1x8x128xf32> to vector<8x128xf32>
      %92 = vector.shape_cast %84 : vector<8x128xf32> to vector<1x8x128xf32>
      tpu.vector_store %arg7[%c1_47, %c0_48, %c0_49], %92 {strides = array<i32>} : memref<2x8x128xf32, #tpu.memory_space<vmem>>, vector<1x8x128xf32>,
      %93 = arith.truncf %86 : vector<8x128xf32> to vector<8x128xbf16>
      %94 = arith.index_cast %6 : i32 to index
      %c0_50 = arith.constant 0 : index
      %c0_51 = arith.constant 0 : index
      %95 = vector.load %arg5[%94, %c0_50, %c0_51] : memref<9x8x128xbf16, #tpu.memory_space<vmem>>, vector<1x8x128xbf16>
      %96 = vector.shape_cast %95 : vector<1x8x128xbf16> to vector<8x128xbf16>
      %97 = vector.shape_cast %93 : vector<8x128xbf16> to vector<1x8x128xbf16>
      tpu.vector_store %arg5[%94, %c0_50, %c0_51], %97 {strides = array<i32>} : memref<9x8x128xbf16, #tpu.memory_space<vmem>>, vector<1x8x128xbf16>,
    }
    %c9_i32_6 = arith.constant 9 : i32
    return
  }
}

</mosaic_0001>

<bundles_post_ra>
// kernel: tpu_custom_call.1
= control target key start
LH: loop header
LB: loop body
LE: loop exit
PB: predicated region body
PF: predicated region fallthrough
CT: control target
= control target key end

     0   :  { %10 = vsyncpa [#allocation5], 0  ;;  %s1790_s0 = inlined_call_operand.hbm [shape: bf16[9,8,128], index: 0, kind: input, shape index: {}]   ;;  %s1791_s1 = inlined_call_operand.hbm [shape: bf16[256,512], index: 1, kind: input, shape index: {}]   ;;  %s1792_s2 = inlined_call_operand.hbm [shape: f32[8,512], index: 2, kind: input, shape index: {}]   ;;  %s1793_s3 = inlined_call_operand.hbm [shape: bf16[256,512], index: 3, kind: input, shape index: {}]   ;;  %s1794_s4 = inlined_call_operand.hbm [shape: f32[8,512], index: 4, kind: input, shape index: {}]   ;;  %s1795_s5 = inlined_call_operand.hbm [shape: bf16[9,8,128], index: 5, kind: output, shape index: {}]  }
   0x1   :  { %11 = vsyncpa [#allocation8], 0 }
   0x2   :  { %12 = vsyncpa [#allocation11], 0 }
   0x3   :  { %13 = vsyncpa [#allocation6], 0  ;;  %s1658_s18 = smov [#allocation7]   ;;  %s1510_s22 = scalar_lea.hbm %s1791_s1, 8192 }
   0x4   :  { %s31_s19 = sshll.u32 %s1658_s18, 4  ;;  %p1511_p0 = scmp.ne.s32.totalorder %s1791_s1, %s1510_s22  ;;  %s32_s19 = int_to_ptr.vmem [resolvable:$true] %s31_s19 }
   0x5   :  { %p1514_p1 = scmp.lt.u32.totalorder %s1510_s22, %s1791_s1 }
   0x7   :  { %p1516_p2 = pnand %p1514_p1, %p1511_p0 }
   0x9   :  { %1519 = shalt.err (!%p1516_p2)
}
   0xa   :  { %s1520_s27 = scalar_lea.vmem %s32_s19, 8192  ;;  %p1525_p4 = scmp.lt.s32.totalorder %s32_s19, %s32_s19 }
   0xb   :  { %p1521_p3 = scmp.ne.s32.totalorder %s32_s19, %s1520_s27  ;;  %p1526_p5 = scmp.lt.s32.totalorder %s1520_s27, %s1520_s27 }
   0xd   :  { %p1527_p6 = por %p1526_p5, %p1525_p4 }
   0xf   :  { %p1528_p7 = pnand %p1527_p6, %p1521_p3 }
  0x11   :  { %1531 = shalt.err (!%p1528_p7)
}
  0x12   :  { %s1659_s28 = smov 256   ;;  %s1660_s29 = smov 16  }
  0x13   :  { %37 = dma.hbm_to_vmem [thread:$0]  %s1791_s1, 8192, %s32_s19, [#allocation8], %s1659_s28, %s1659_s28, %s1660_s29  }
  0x14   :  { %s1661_s7 = smov [#allocation10]   ;;  %s1662_s9 = smov [#allocation4]  }
  0x15   :  { %s53_s8 = sshll.u32 %s1661_s7, 4  ;;  %s19_s10 = sshll.u32 %s1662_s9, 4  ;;  %s54_s8 = int_to_ptr.vmem [resolvable:$true] %s53_s8  ;;  %s20_s10 = int_to_ptr.vmem [resolvable:$true] %s19_s10 }
  0x16   :  { %s1532_s13 = scalar_lea.hbm %s1793_s3, 8192 }
  0x17   :  { %p1533_p8 = scmp.ne.s32.totalorder %s1793_s3, %s1532_s13  ;;  %p1536_p9 = scmp.lt.u32.totalorder %s1532_s13, %s1793_s3 }
  0x19   :  { %p1538_p10 = pnand %p1536_p9, %p1533_p8 }
  0x1b   :  { %1541 = shalt.err (!%p1538_p10)
}
  0x1c   :  { %s1542_s1 = scalar_lea.vmem %s54_s8, 8192  ;;  %p1547_p12 = scmp.lt.s32.totalorder %s54_s8, %s54_s8 }
  0x1d   :  { %p1543_p11 = scmp.ne.s32.totalorder %s54_s8, %s1542_s1  ;;  %p1548_p13 = scmp.lt.s32.totalorder %s1542_s1, %s1542_s1 }
  0x1f   :  { %p1549_p0 = por %p1548_p13, %p1547_p12 }
  0x21   :  { %p1550_p1 = pnand %p1549_p0, %p1543_p11 }
  0x23   :  { %1553 = shalt.err (!%p1550_p1)
}
  0x24   :  { %59 = dma.hbm_to_vmem [thread:$0]  %s1793_s3, 8192, %s54_s8, [#allocation11], %s1659_s28, %s1659_s28, %s1660_s29  }
  0x25   :  { %s1554_s22 = scalar_lea.hbm %s1790_s0, 576 }
  0x26   :  { %p1555_p2 = scmp.ne.s32.totalorder %s1790_s0, %s1554_s22  ;;  %p1558_p3 = scmp.lt.u32.totalorder %s1554_s22, %s1790_s0 }
  0x28   :  { %p1560_p4 = pnand %p1558_p3, %p1555_p2 }
  0x2a   :  { %1563 = shalt.err (!%p1560_p4)
}
  0x2b   :  { %s1564_s27 = scalar_lea.vmem %s20_s10, 576  ;;  %p1569_p6 = scmp.lt.s32.totalorder %s20_s10, %s20_s10 }
  0x2c   :  { %p1565_p5 = scmp.ne.s32.totalorder %s20_s10, %s1564_s27  ;;  %p1570_p7 = scmp.lt.s32.totalorder %s1564_s27, %s1564_s27 }
  0x2e   :  { %p1571_p8 = por %p1570_p7, %p1569_p6 }
  0x30   :  { %p1572_p9 = pnand %p1571_p8, %p1565_p5 }
  0x32   :  { %1575 = shalt.err (!%p1572_p9)
}
  0x33   :  { %s1663_s3 = smov 64   ;;  %s1664_s28 = smov 4  }
  0x34   :  { %25 = dma.hbm_to_vmem [thread:$0]  %s1790_s0, 576, %s20_s10, [#allocation5], %s1663_s3, %s1663_s3, %s1664_s28  }
  0x35   :  { %s1665_s6 = smov [#allocation9]   ;;  %s1666_s8 = smov [#allocation12]  }
  0x36   :  { %s44_s7 = sshll.u32 %s1665_s6, 4  ;;  %s66_s9 = sshll.u32 %s1666_s8, 4  ;;  %s45_s7 = int_to_ptr.vmem [resolvable:$true] %s44_s7  ;;  %s67_s9 = int_to_ptr.vmem [resolvable:$true] %s66_s9 }
  0x37   :  { %s1576_s13 = scalar_lea.hbm %s1792_s2, 512 }
  0x38   :  { %p1577_p10 = scmp.ne.s32.totalorder %s1792_s2, %s1576_s13  ;;  %p1580_p11 = scmp.lt.u32.totalorder %s1576_s13, %s1792_s2 }
  0x3a   :  { %p1582_p12 = pnand %p1580_p11, %p1577_p10 }
  0x3c   :  { %1585 = shalt.err (!%p1582_p12)
}
  0x3d   :  { %s1586_s0 = scalar_lea.vmem %s45_s7, 512  ;;  %p1591_p0 = scmp.lt.s32.totalorder %s45_s7, %s45_s7 }
  0x3e   :  { %p1587_p13 = scmp.ne.s32.totalorder %s45_s7, %s1586_s0  ;;  %p1592_p1 = scmp.lt.s32.totalorder %s1586_s0, %s1586_s0 }
  0x40   :  { %p1593_p2 = por %p1592_p1, %p1591_p0 }
  0x42   :  { %p1594_p3 = pnand %p1593_p2, %p1587_p13 }
  0x44   :  { %1597 = shalt.err (!%p1594_p3)
}
  0x45   :  { %47 = dma.hbm_to_vmem [thread:$0]  %s1792_s2, 512, %s45_s7, [#allocation8]  }
  0x46   :  { %s1598_s20 = scalar_lea.hbm %s1794_s4, 512 }
  0x47   :  { %p1599_p4 = scmp.ne.s32.totalorder %s1794_s4, %s1598_s20  ;;  %p1602_p5 = scmp.lt.u32.totalorder %s1598_s20, %s1794_s4 }
  0x49   :  { %p1604_p6 = pnand %p1602_p5, %p1599_p4 }
  0x4b   :  { %1607 = shalt.err (!%p1604_p6)
}
  0x4c   :  { %s1608_s25 = scalar_lea.vmem %s67_s9, 512  ;;  %p1613_p8 = scmp.lt.s32.totalorder %s67_s9, %s67_s9 }
  0x4d   :  { %p1609_p7 = scmp.ne.s32.totalorder %s67_s9, %s1608_s25  ;;  %p1614_p9 = scmp.lt.s32.totalorder %s1608_s25, %s1608_s25 }
  0x4f   :  { %p1615_p10 = por %p1614_p9, %p1613_p8 }
  0x51   :  { %p1616_p11 = pnand %p1615_p10, %p1609_p7 }
  0x53   :  { %1619 = shalt.err (!%p1616_p11)
}
  0x54   :  { %69 = dma.hbm_to_vmem [thread:$0]  %s1794_s4, 512, %s67_s9, [#allocation11]  }
  0x55   :  { %1646 = dma.done.wait [#allocation5], 576  }
  0x56   :  { %1647 = vsyncadd [#allocation5], 4294966720 }
  0x57   :  { %1648 = dma.done.wait [#allocation8], 8704  }
  0x58   :  { %1649 = vsyncadd [#allocation8], 4294958592 }
  0x59   :  { %1650 = dma.done.wait [#allocation11], 8704  }
  0x5a   :  { %1651 = vsyncadd [#allocation11], 4294958592  ;;  %v1667_v0 = vmov 0.0   ;;  %s1762_s27 = smov 0  }
  0x5b   :  { %85 = vst [vmem:[#allocation2] sm:$0xff] %v1667_v0  ;;  %86 = vst [vmem:[#allocation2 + $0x8] sm:$0xff] %v1667_v0 }
  0x5c   :  { %87 = vst [vmem:[#allocation3] sm:$0xff] %v1667_v0  ;;  %88 = vst [vmem:[#allocation3 + $0x8] sm:$0xff] %v1667_v0 }
  0x5d LB: > { %v1286_v1 = vld [vmem:[#allocation7 + $0x4] ss:$16 sps:$4 sm:$0xff]   ;;  %v1288_v2 = vld [vmem:[#allocation7] ss:$16 sps:$4 sm:$0xff]   ;;  %v1297_v6 = vld [vmem:[#allocation7 + $0xc] ss:$16 sps:$4 sm:$0xff]   ;;  %s1656_s27 = sphi %s1762_s27, %s94_s27  }
  0x5e   : > { %489 = vmatprep.subr.bf16.mxu0 %v1286_v1  ;;  %v1289_v3 = vld [vmem:[#allocation7 + $0x24] ss:$16 sps:$4 sm:$0xff]   ;;  %v1291_v4 = vld [vmem:[#allocation7 + $0x20] ss:$16 sps:$4 sm:$0xff]   ;;  %v1300_v7 = vld [vmem:[#allocation7 + $0x8] ss:$16 sps:$4 sm:$0xff]   ;;  %530 = vmatprep.subr.bf16.mxu1 %v1297_v6 }
  0x5f   : > { %490 = vmatpush1.bf16.msra.mxu0 %v1288_v2  ;;  %v1292_v5 = vld [vmem:[#allocation7 + $0x44] ss:$16 sps:$4 sm:$0xff]   ;;  %v1294_v8 = vld [vmem:[#allocation7 + $0x40] ss:$16 sps:$4 sm:$0xff]   ;;  %531 = vmatpush1.bf16.msra.mxu1 %v1300_v7  ;;  %v1303_v10 = vld [vmem:[#allocation7 + $0x2c] ss:$16 sps:$4 sm:$0xff]  }
  0x60   : > { %491 = vmatprep.subr.bf16.mxu0 %v1289_v3  ;;  %v1295_v9 = vld [vmem:[#allocation7 + $0x64] ss:$16 sps:$4 sm:$0xff]   ;;  %v1306_v11 = vld [vmem:[#allocation7 + $0x28] ss:$16 sps:$4 sm:$0xff]   ;;  %532 = vmatprep.subr.bf16.mxu1 %v1303_v10  ;;  %v1299_v12 = vld [vmem:[#allocation7 + $0x60] ss:$16 sps:$4 sm:$0xff]  }
  0x61   : > { %v1301_v13 = vld [vmem:[#allocation7 + $0x84] ss:$16 sps:$4 sm:$0xff]   ;;  %v1309_v14 = vld [vmem:[#allocation7 + $0x4c] ss:$16 sps:$4 sm:$0xff]   ;;  %v1312_v15 = vld [vmem:[#allocation7 + $0x48] ss:$16 sps:$4 sm:$0xff]  }
  0x62   : > { %v1315_v16 = vld [vmem:[#allocation7 + $0x6c] ss:$16 sps:$4 sm:$0xff]   ;;  %v1305_v17 = vld [vmem:[#allocation7 + $0x80] ss:$16 sps:$4 sm:$0xff]   ;;  %v1307_v18 = vld [vmem:[#allocation7 + $0xa4] ss:$16 sps:$4 sm:$0xff]  }
  0x63   : > { %492 = vmatpush1.bf16.msra.mxu0 %v1291_v4  ;;  %533 = vmatpush1.bf16.msra.mxu1 %v1306_v11  ;;  %v1318_v19 = vld [vmem:[#allocation7 + $0x68] ss:$16 sps:$4 sm:$0xff]   ;;  %v1321_v20 = vld [vmem:[#allocation7 + $0x8c] ss:$16 sps:$4 sm:$0xff]   ;;  %v1311_v21 = vld [vmem:[#allocation7 + $0xa0] ss:$16 sps:$4 sm:$0xff]  }
  0x64   : > { %493 = vmatprep.subr.bf16.mxu0 %v1292_v5  ;;  %534 = vmatprep.subr.bf16.mxu1 %v1309_v14  ;;  %v1313_v22 = vld [vmem:[#allocation7 + $0xc4] ss:$16 sps:$4 sm:$0xff]   ;;  %v1324_v23 = vld [vmem:[#allocation7 + $0x88] ss:$16 sps:$4 sm:$0xff]   ;;  %v1327_v24 = vld [vmem:[#allocation7 + $0xac] ss:$16 sps:$4 sm:$0xff]  }
  0x65   : > { %v1317_v25 = vld [vmem:[#allocation7 + $0xc0] ss:$16 sps:$4 sm:$0xff]   ;;  %v1319_v26 = vld [vmem:[#allocation7 + $0xe4] ss:$16 sps:$4 sm:$0xff]   ;;  %v1330_v27 = vld [vmem:[#allocation7 + $0xa8] ss:$16 sps:$4 sm:$0xff]  }
  0x66   : > { %v1333_v28 = vld [vmem:[#allocation7 + $0xcc] ss:$16 sps:$4 sm:$0xff]   ;;  %v1323_v29 = vld [vmem:[#allocation7 + $0xe0] ss:$16 sps:$4 sm:$0xff]   ;;  %v1325_v30 = vld [vmem:[#allocation7 + $0x104] ss:$16 sps:$4 sm:$0xff]  }
  0x67   : > { %494 = vmatpush1.bf16.msra.mxu0 %v1294_v8  ;;  %535 = vmatpush1.bf16.msra.mxu1 %v1312_v15  ;;  %v1336_v31 = vld [vmem:[#allocation7 + $0xc8] ss:$16 sps:$4 sm:$0xff]   ;;  %v1339_v32 = vld [vmem:[#allocation7 + $0xec] ss:$16 sps:$4 sm:$0xff]   ;;  %v1329_v33 = vld [vmem:[#allocation7 + $0x100] ss:$16 sps:$4 sm:$0xff]  }
  0x68   : > { %495 = vmatprep.subr.bf16.mxu0 %v1295_v9  ;;  %536 = vmatprep.subr.bf16.mxu1 %v1315_v16  ;;  %v1331_v34 = vld [vmem:[#allocation7 + $0x124] ss:$16 sps:$4 sm:$0xff]   ;;  %v1342_v35 = vld [vmem:[#allocation7 + $0xe8] ss:$16 sps:$4 sm:$0xff]   ;;  %v1345_v36 = vld [vmem:[#allocation7 + $0x10c] ss:$16 sps:$4 sm:$0xff]  }
  0x69   : > { %v1335_v37 = vld [vmem:[#allocation7 + $0x120] ss:$16 sps:$4 sm:$0xff]   ;;  %v1337_v38 = vld [vmem:[#allocation7 + $0x144] ss:$16 sps:$4 sm:$0xff]   ;;  %v1348_v39 = vld [vmem:[#allocation7 + $0x108] ss:$16 sps:$4 sm:$0xff]  }
  0x6a   : > { %v1351_v40 = vld [vmem:[#allocation7 + $0x12c] ss:$16 sps:$4 sm:$0xff]   ;;  %v1341_v42 = vld [vmem:[#allocation7 + $0x140] ss:$16 sps:$4 sm:$0xff]   ;;  %v1343_v44 = vld [vmem:[#allocation7 + $0x164] ss:$16 sps:$4 sm:$0xff]  }
  0x6b   : > { %496 = vmatpush1.bf16.msra.mxu0 %v1299_v12  ;;  %537 = vmatpush1.bf16.msra.mxu1 %v1318_v19  ;;  %v166_v41 = vld [vmem:[#allocation2] sm:$0xff]  ;;  %v1354_v45 = vld [vmem:[#allocation7 + $0x128] ss:$16 sps:$4 sm:$0xff]   ;;  %v1349_v48 = vld [vmem:[#allocation7 + $0x184] ss:$16 sps:$4 sm:$0xff]   ;;  %s1131_s4 = sshll.u32 %s1656_s27, 2 }
  0x6c   : > { %497 = vmatprep.subr.bf16.mxu0 %v1301_v13  ;;  %538 = vmatprep.subr.bf16.mxu1 %v1321_v20  ;;  %v168_v43 = vpack.c.bf16 %v166_v41, %v166_v41  ;;  %v1357_v46 = vld [vmem:[#allocation7 + $0x14c] ss:$16 sps:$4 sm:$0xff]   ;;  %v1347_v47 = vld [vmem:[#allocation7 + $0x160] ss:$16 sps:$4 sm:$0xff]   ;;  %v1360_v49 = vld [vmem:[#allocation7 + $0x148] ss:$16 sps:$4 sm:$0xff]  }
  0x6d   : > { %v1363_v50 = vld [vmem:[#allocation7 + $0x16c] ss:$16 sps:$4 sm:$0xff]   ;;  %v1353_v51 = vld [vmem:[#allocation7 + $0x180] ss:$16 sps:$4 sm:$0xff]   ;;  %v1355_v52 = vld [vmem:[#allocation7 + $0x1a4] ss:$16 sps:$4 sm:$0xff]  }
  0x6e   : > { %521 = vmatprep.mubr.bf16.mxu0 %v168_v43  ;;  %562 = vmatprep.mubr.bf16.mxu1 %v168_v43  ;;  %v1366_v53 = vld [vmem:[#allocation7 + $0x168] ss:$16 sps:$4 sm:$0xff]   ;;  %v1369_v54 = vld [vmem:[#allocation7 + $0x18c] ss:$16 sps:$4 sm:$0xff]   ;;  %v1359_v55 = vld [vmem:[#allocation7 + $0x1a0] ss:$16 sps:$4 sm:$0xff]  }
  0x6f   : > { %498 = vmatpush1.bf16.msra.mxu0 %v1305_v17  ;;  %539 = vmatpush1.bf16.msra.mxu1 %v1324_v23  ;;  %v1361_v56 = vld [vmem:[#allocation7 + $0x1c4] ss:$16 sps:$4 sm:$0xff]   ;;  %v1372_v57 = vld [vmem:[#allocation7 + $0x188] ss:$16 sps:$4 sm:$0xff]   ;;  %v1365_v58 = vld [vmem:[#allocation7 + $0x1c0] ss:$16 sps:$4 sm:$0xff]  }
  0x70   : > { %499 = vmatprep.subr.bf16.mxu0 %v1307_v18  ;;  %540 = vmatprep.subr.bf16.mxu1 %v1327_v24  ;;  %v1373_v59 = vld [vmem:[#allocation7 + $0x1ac] ss:$16 sps:$4 sm:$0xff]   ;;  %v1367_v60 = vld [vmem:[#allocation7 + $0x1e4] ss:$16 sps:$4 sm:$0xff]   ;;  %v1375_v61 = vld [vmem:[#allocation7 + $0x1a8] ss:$16 sps:$4 sm:$0xff]  }
  0x71   : > { %v1376_v62 = vld [vmem:[#allocation7 + $0x1cc] ss:$16 sps:$4 sm:$0xff]   ;;  %v1371_v63 = vld [vmem:[#allocation7 + $0x1e0] ss:$16 sps:$4 sm:$0xff]   ;;  %v1378_v0 = vld [vmem:[#allocation7 + $0x1c8] ss:$16 sps:$4 sm:$0xff]  }
  0x72   : > { %v1384_v1 = vld [vmem:[#allocation10 + $0x4] ss:$16 sps:$4 sm:$0xff]   ;;  %v1379_v2 = vld [vmem:[#allocation7 + $0x1ec] ss:$16 sps:$4 sm:$0xff]   ;;  %s96_s29 = scalar_lea.vmem [#allocation4], %s1131_s4  ;;  %s1101_s30 = scalar_lea.vmem [#allocation13], %s1131_s4 }
  0x73   : > { %500 = vmatpush1.bf16.msra.mxu0 %v1311_v21  ;;  %541 = vmatpush1.bf16.msra.mxu1 %v1330_v27  ;;  %v97_v3 = vld [vmem:[%s96_s29] sm:$0xf]  ;;  %v1382_v4 = vld [vmem:[#allocation10] ss:$16 sps:$4 sm:$0xff]   ;;  %v1381_v5 = vld [vmem:[#allocation7 + $0x1e8] ss:$16 sps:$4 sm:$0xff]  }
  0x74   : > { %501 = vmatprep.subr.bf16.mxu0 %v1313_v22  ;;  %542 = vmatprep.subr.bf16.mxu1 %v1333_v28  ;;  %v1390_v6 = vld [vmem:[#allocation10 + $0x24] ss:$16 sps:$4 sm:$0xff]   ;;  %v1387_v7 = vld [vmem:[#allocation10 + $0xc] ss:$16 sps:$4 sm:$0xff]   ;;  %v1388_v8 = vld [vmem:[#allocation10 + $0x20] ss:$16 sps:$4 sm:$0xff]  }
  0x75   : > { %v1385_v9 = vld [vmem:[#allocation10 + $0x8] ss:$16 sps:$4 sm:$0xff]   ;;  %v1396_v10 = vld [vmem:[#allocation10 + $0x44] ss:$16 sps:$4 sm:$0xff]   ;;  %v1393_v11 = vld [vmem:[#allocation10 + $0x2c] ss:$16 sps:$4 sm:$0xff]  }
  0x76   : > { %v1394_v12 = vld [vmem:[#allocation10 + $0x40] ss:$16 sps:$4 sm:$0xff]   ;;  %v1391_v13 = vld [vmem:[#allocation10 + $0x28] ss:$16 sps:$4 sm:$0xff]   ;;  %v1402_v14 = vld [vmem:[#allocation10 + $0x64] ss:$16 sps:$4 sm:$0xff]  }
  0x77   : > { %502 = vmatpush1.bf16.msra.mxu0 %v1317_v25  ;;  %543 = vmatpush1.bf16.msra.mxu1 %v1336_v31  ;;  %v1399_v15 = vld [vmem:[#allocation10 + $0x4c] ss:$16 sps:$4 sm:$0xff]   ;;  %v1400_v16 = vld [vmem:[#allocation10 + $0x60] ss:$16 sps:$4 sm:$0xff]   ;;  %v1397_v17 = vld [vmem:[#allocation10 + $0x48] ss:$16 sps:$4 sm:$0xff]  }
  0x78   : > { %503 = vmatprep.subr.bf16.mxu0 %v1319_v26  ;;  %544 = vmatprep.subr.bf16.mxu1 %v1339_v32  ;;  %v1405_v18 = vld [vmem:[#allocation10 + $0x6c] ss:$16 sps:$4 sm:$0xff]   ;;  %v1403_v19 = vld [vmem:[#allocation10 + $0x68] ss:$16 sps:$4 sm:$0xff]   ;;  %v1408_v20 = vld [vmem:[#allocation10 + $0x84] ss:$16 sps:$4 sm:$0xff]  }
  0x79   : > { %v1411_v21 = vld [vmem:[#allocation10 + $0x8c] ss:$16 sps:$4 sm:$0xff]   ;;  %v1406_v22 = vld [vmem:[#allocation10 + $0x80] ss:$16 sps:$4 sm:$0xff]   ;;  %v1409_v23 = vld [vmem:[#allocation10 + $0x88] ss:$16 sps:$4 sm:$0xff]  }
  0x7a   : > { %v1414_v24 = vld [vmem:[#allocation10 + $0xa4] ss:$16 sps:$4 sm:$0xff]   ;;  %v1417_v25 = vld [vmem:[#allocation10 + $0xac] ss:$16 sps:$4 sm:$0xff]   ;;  %v1412_v26 = vld [vmem:[#allocation10 + $0xa0] ss:$16 sps:$4 sm:$0xff]  }
  0x7b   : > { %504 = vmatpush1.bf16.msra.mxu0 %v1323_v29  ;;  %545 = vmatpush1.bf16.msra.mxu1 %v1342_v35  ;;  %v1415_v27 = vld [vmem:[#allocation10 + $0xa8] ss:$16 sps:$4 sm:$0xff]   ;;  %v1420_v28 = vld [vmem:[#allocation10 + $0xc4] ss:$16 sps:$4 sm:$0xff]   ;;  %v1423_v29 = vld [vmem:[#allocation10 + $0xcc] ss:$16 sps:$4 sm:$0xff]  }
  0x7c   : > { %505 = vmatprep.subr.bf16.mxu0 %v1325_v30  ;;  %546 = vmatprep.subr.bf16.mxu1 %v1345_v36  ;;  %v1418_v30 = vld [vmem:[#allocation10 + $0xc0] ss:$16 sps:$4 sm:$0xff]   ;;  %v1421_v31 = vld [vmem:[#allocation10 + $0xc8] ss:$16 sps:$4 sm:$0xff]   ;;  %v1426_v32 = vld [vmem:[#allocation10 + $0xe4] ss:$16 sps:$4 sm:$0xff]  }
  0x7d   : > { %v1427_v35 = vld [vmem:[#allocation10 + $0xe8] ss:$16 sps:$4 sm:$0xff]   ;;  %v1432_v36 = vld [vmem:[#allocation10 + $0x104] ss:$16 sps:$4 sm:$0xff]   ;;  %v1441_v41 = vld [vmem:[#allocation10 + $0x12c] ss:$16 sps:$4 sm:$0xff]  }
  0x7e   : > { %v1439_v43 = vld [vmem:[#allocation10 + $0x128] ss:$16 sps:$4 sm:$0xff]   ;;  %s94_s27 = sadd.s32 1, %s1656_s27  }
  0x7f   : > { %506 = vmatpush1.bf16.msra.mxu0 %v1329_v33  ;;  %547 = vmatpush1.bf16.msra.mxu1 %v1348_v39  ;;  %v1429_v33 = vld [vmem:[#allocation10 + $0xec] ss:$16 sps:$4 sm:$0xff]   ;;  %p91_p12 = scmp.ge.s32.totalorder %s94_s27, 9  }
  0x80   : > { %507 = vmatprep.subr.bf16.mxu0 %v1331_v34  ;;  %548 = vmatprep.subr.bf16.mxu1 %v1351_v40  ;;  %v1424_v34 = vld [vmem:[#allocation10 + $0xe0] ss:$16 sps:$4 sm:$0xff]   ;;  %v1435_v39 = vld [vmem:[#allocation10 + $0x10c] ss:$16 sps:$4 sm:$0xff]   ;;  %v1438_v40 = vld [vmem:[#allocation10 + $0x124] ss:$16 sps:$4 sm:$0xff]  }
  0x81   :  { %s1668_s6 = smov (%p91_p12), [#allocation13]  }
  0x82   :  { %s1108_s7 = sshll.u32 (%p91_p12), %s1668_s6, 4  ;;  %s1109_s7 = int_to_ptr.vmem [resolvable:$true] %s1108_s7 }
  0x83   : > { %508 = vmatpush1.bf16.msra.mxu0 %v1335_v37  ;;  %549 = vmatpush1.bf16.msra.mxu1 %v1354_v45  ;;  %v1430_v37 = vld [vmem:[#allocation10 + $0x100] ss:$16 sps:$4 sm:$0xff]   ;;  %v1447_v45 = vld [vmem:[#allocation10 + $0x14c] ss:$16 sps:$4 sm:$0xff]   ;;  %s1620_s8 = scalar_lea.vmem (%p91_p12), %s1109_s7, 576  ;;  %p1625_p0 = scmp.lt.s32.totalorder (%p91_p12), %s1109_s7, %s1109_s7 }
  0x84   : > { %509 = vmatprep.subr.bf16.mxu0 %v1337_v38  ;;  %550 = vmatprep.subr.bf16.mxu1 %v1357_v46  ;;  %v1433_v38 = vld [vmem:[#allocation10 + $0x108] ss:$16 sps:$4 sm:$0xff]   ;;  %v1442_v46 = vld [vmem:[#allocation10 + $0x140] ss:$16 sps:$4 sm:$0xff]   ;;  %p1621_p13 = scmp.ne.s32.totalorder (%p91_p12), %s1109_s7, %s1620_s8  ;;  %p1626_p1 = scmp.lt.s32.totalorder (%p91_p12), %s1620_s8, %s1620_s8 }
  0x86   :  { %p1627_p2 = por (%p91_p12), %p1626_p1, %p1625_p0 }
  0x87   : > { %510 = vmatpush1.bf16.msra.mxu0 %v1341_v42  ;;  %551 = vmatpush1.bf16.msra.mxu1 %v1360_v49  ;;  %v1436_v42 = vld [vmem:[#allocation10 + $0x120] ss:$16 sps:$4 sm:$0xff]   ;;  %v1453_v49 = vld [vmem:[#allocation10 + $0x16c] ss:$16 sps:$4 sm:$0xff]  }
  0x88   : > { %511 = vmatprep.subr.bf16.mxu0 %v1343_v44  ;;  %552 = vmatprep.subr.bf16.mxu1 %v1363_v50  ;;  %v1444_v44 = vld [vmem:[#allocation10 + $0x144] ss:$16 sps:$4 sm:$0xff]   ;;  %v1448_v50 = vld [vmem:[#allocation10 + $0x160] ss:$16 sps:$4 sm:$0xff]   ;;  %p1628_p3 = pnand (%p91_p12), %p1627_p2, %p1621_p13 }
  0x8b   : > { %512 = vmatpush1.bf16.msra.mxu0 %v1347_v47  ;;  %553 = vmatpush1.bf16.msra.mxu1 %v1366_v53  ;;  %v1445_v47 = vld [vmem:[#allocation10 + $0x148] ss:$16 sps:$4 sm:$0xff]   ;;  %v1459_v53 = vld [vmem:[#allocation10 + $0x18c] ss:$16 sps:$4 sm:$0xff]  }
  0x8c   : > { %513 = vmatprep.subr.bf16.mxu0 %v1349_v48  ;;  %554 = vmatprep.subr.bf16.mxu1 %v1369_v54  ;;  %v1450_v48 = vld [vmem:[#allocation10 + $0x164] ss:$16 sps:$4 sm:$0xff]   ;;  %v1454_v54 = vld [vmem:[#allocation10 + $0x180] ss:$16 sps:$4 sm:$0xff]  }
  0x8f   : > { %514 = vmatpush1.bf16.msra.mxu0 %v1353_v51  ;;  %555 = vmatpush1.bf16.msra.mxu1 %v1372_v57  ;;  %v1451_v51 = vld [vmem:[#allocation10 + $0x168] ss:$16 sps:$4 sm:$0xff]   ;;  %v1462_v57 = vld [vmem:[#allocation10 + $0x1a4] ss:$16 sps:$4 sm:$0xff]  }
  0x90   : > { %515 = vmatprep.subr.bf16.mxu0 %v1355_v52  ;;  %556 = vmatprep.subr.bf16.mxu1 %v1373_v59  ;;  %v1456_v52 = vld [vmem:[#allocation10 + $0x184] ss:$16 sps:$4 sm:$0xff]   ;;  %v1465_v59 = vld [vmem:[#allocation10 + $0x1ac] ss:$16 sps:$4 sm:$0xff]  }
  0x93   : > { %516 = vmatpush1.bf16.msra.mxu0 %v1359_v55  ;;  %557 = vmatpush1.bf16.msra.mxu1 %v1375_v61  ;;  %v1457_v55 = vld [vmem:[#allocation10 + $0x188] ss:$16 sps:$4 sm:$0xff]   ;;  %v1471_v61 = vld [vmem:[#allocation10 + $0x1cc] ss:$16 sps:$4 sm:$0xff]  }
  0x94   : > { %517 = vmatprep.subr.bf16.mxu0 %v1361_v56  ;;  %558 = vmatprep.subr.bf16.mxu1 %v1376_v62  ;;  %v1460_v56 = vld [vmem:[#allocation10 + $0x1a0] ss:$16 sps:$4 sm:$0xff]  }
  0x95   : > { %v1466_v62 = vld [vmem:[#allocation10 + $0x1c0] ss:$16 sps:$4 sm:$0xff]  }
  0x97   : > { %518 = vmatpush1.bf16.msra.mxu0 %v1365_v58  ;;  %559 = vmatpush1.bf16.msra.mxu1 %v1378_v0  ;;  %v1463_v58 = vld [vmem:[#allocation10 + $0x1a8] ss:$16 sps:$4 sm:$0xff]  }
  0x98   : > { %519 = vmatprep.subr.bf16.mxu0 %v1367_v60  ;;  %560 = vmatprep.subr.bf16.mxu1 %v1379_v2  ;;  %v1468_v60 = vld [vmem:[#allocation10 + $0x1c4] ss:$16 sps:$4 sm:$0xff]   ;;  %v1469_v0 = vld [vmem:[#allocation10 + $0x1c8] ss:$16 sps:$4 sm:$0xff]  }
  0x9b   : > { %520 = vmatpush1.bf16.msra.mxu0 %v1371_v63  ;;  %561 = vmatpush1.bf16.msra.mxu1 %v1381_v5  ;;  %v667_v63 = vld [vmem:[#allocation2 + $0x8] sm:$0xff] }
  0x9c   : > { %991 = vmatprep.subr.bf16.mxu0 %v1384_v1  ;;  %1032 = vmatprep.subr.bf16.mxu1 %v1387_v7  ;;  %v1474_v1 = vld [vmem:[#allocation10 + $0x1e4] ss:$16 sps:$4 sm:$0xff]   ;;  %v670_v2 = vpack.c.bf16 %v667_v63, %v667_v63  ;;  %v1475_v5 = vld [vmem:[#allocation10 + $0x1e8] ss:$16 sps:$4 sm:$0xff]  }
  0x9d   : > { %v163_v7 = vld [vmem:[#allocation9 + $0x8] sm:$0xff] }
  0x9e   : > { %522 = vmatmul.mubr.bf16.vlgmr.msra.gmra.mrb[0].mxu0 %v97_v3  ;;  %563 = vmatmul.mubr.bf16.vlgmr.msra.gmra.mrb[0].mxu1 %v97_v3  ;;  %v1477_v3 = vld [vmem:[#allocation10 + $0x1ec] ss:$16 sps:$4 sm:$0xff]  }
  0x9f   : > { %992 = vmatpush1.bf16.msra.mxu0 %v1382_v4  ;;  %1033 = vmatpush1.bf16.msra.mxu1 %v1385_v9  ;;  %v1472_v4 = vld [vmem:[#allocation10 + $0x1e0] ss:$16 sps:$4 sm:$0xff]  }
  0xa0   : > { %993 = vmatprep.subr.bf16.mxu0 %v1390_v6  ;;  %1034 = vmatprep.subr.bf16.mxu1 %v1393_v11  ;;  %v162_v6 = vld [vmem:[#allocation9] sm:$0xff] }
  0xa1   : > { %1023 = vmatprep.mubr.bf16.mxu0 %v670_v2  ;;  %1064 = vmatprep.mubr.bf16.mxu1 %v670_v2 }
  0xa3   : > { %994 = vmatpush1.bf16.msra.mxu0 %v1388_v8  ;;  %1035 = vmatpush1.bf16.msra.mxu1 %v1391_v13 }
  0xa4   : > { %995 = vmatprep.subr.bf16.mxu0 %v1396_v10  ;;  %1036 = vmatprep.subr.bf16.mxu1 %v1399_v15 }
  0xa7   : > { %996 = vmatpush1.bf16.msra.mxu0 %v1394_v12  ;;  %1037 = vmatpush1.bf16.msra.mxu1 %v1397_v17 }
  0xa8   : > { %997 = vmatprep.subr.bf16.mxu0 %v1402_v14  ;;  %1038 = vmatprep.subr.bf16.mxu1 %v1405_v18 }
  0xab   : > { %998 = vmatpush1.bf16.msra.mxu0 %v1400_v16  ;;  %1039 = vmatpush1.bf16.msra.mxu1 %v1403_v19  ;;  %v165_v16 = vld [vmem:[#allocation9 + $0x18] sm:$0xff] }
  0xac   : > { %999 = vmatprep.subr.bf16.mxu0 %v1408_v20  ;;  %1040 = vmatprep.subr.bf16.mxu1 %v1411_v21 }
  0xaf   : > { %1000 = vmatpush1.bf16.msra.mxu0 %v1406_v22  ;;  %1041 = vmatpush1.bf16.msra.mxu1 %v1409_v23  ;;  %v164_v22 = vld [vmem:[#allocation9 + $0x10] sm:$0xff] }
  0xb0   : > { %1001 = vmatprep.subr.bf16.mxu0 %v1414_v24  ;;  %1042 = vmatprep.subr.bf16.mxu1 %v1417_v25 }
  0xb3   : > { %1002 = vmatpush1.bf16.msra.mxu0 %v1412_v26  ;;  %1043 = vmatpush1.bf16.msra.mxu1 %v1415_v27 }
  0xb4   : > { %1003 = vmatprep.subr.bf16.mxu0 %v1420_v28  ;;  %1044 = vmatprep.subr.bf16.mxu1 %v1423_v29 }
  0xb7   : > { %1004 = vmatpush1.bf16.msra.mxu0 %v1418_v30  ;;  %1045 = vmatpush1.bf16.msra.mxu1 %v1421_v31  ;;  %v167_v31 = vld [vmem:[#allocation3] sm:$0xff] }
  0xb8   : > { %1005 = vmatprep.subr.bf16.mxu0 %v1426_v32  ;;  %1046 = vmatprep.subr.bf16.mxu1 %v1429_v33 }
  0xbb   : > { %1006 = vmatpush1.bf16.msra.mxu0 %v1424_v34  ;;  %1047 = vmatpush1.bf16.msra.mxu1 %v1427_v35 }
  0xbc   : > { %1007 = vmatprep.subr.bf16.mxu0 %v1432_v36  ;;  %1048 = vmatprep.subr.bf16.mxu1 %v1435_v39 }
  0xbf   : > { %1008 = vmatpush1.bf16.msra.mxu0 %v1430_v37  ;;  %1049 = vmatpush1.bf16.msra.mxu1 %v1433_v38 }
  0xc0   : > { %1009 = vmatprep.subr.bf16.mxu0 %v1438_v40  ;;  %1050 = vmatprep.subr.bf16.mxu1 %v1441_v41 }
  0xc3   : > { %1010 = vmatpush1.bf16.msra.mxu0 %v1436_v42  ;;  %1051 = vmatpush1.bf16.msra.mxu1 %v1439_v43  ;;  %v662_v42 = vld [vmem:[#allocation12] sm:$0xff]  ;;  %v663_v43 = vld [vmem:[#allocation12 + $0x8] sm:$0xff] }
  0xc4   : > { %1011 = vmatprep.subr.bf16.mxu0 %v1444_v44  ;;  %1052 = vmatprep.subr.bf16.mxu1 %v1447_v45 }
  0xc7   : > { %1012 = vmatpush1.bf16.msra.mxu0 %v1442_v46  ;;  %1053 = vmatpush1.bf16.msra.mxu1 %v1445_v47 }
  0xc8   : > { %1013 = vmatprep.subr.bf16.mxu0 %v1450_v48  ;;  %1054 = vmatprep.subr.bf16.mxu1 %v1453_v49 }
  0xcb   : > { %1014 = vmatpush1.bf16.msra.mxu0 %v1448_v50  ;;  %1055 = vmatpush1.bf16.msra.mxu1 %v1451_v51 }
  0xcc   : > { %1015 = vmatprep.subr.bf16.mxu0 %v1456_v52  ;;  %1056 = vmatprep.subr.bf16.mxu1 %v1459_v53 }
  0xcf   : > { %1016 = vmatpush1.bf16.msra.mxu0 %v1454_v54  ;;  %1057 = vmatpush1.bf16.msra.mxu1 %v1457_v55 }
  0xd0   : > { %1017 = vmatprep.subr.bf16.mxu0 %v1462_v57  ;;  %1058 = vmatprep.subr.bf16.mxu1 %v1465_v59 }
  0xd3   : > { %1018 = vmatpush1.bf16.msra.mxu0 %v1460_v56  ;;  %1059 = vmatpush1.bf16.msra.mxu1 %v1463_v58  ;;  %v665_v56 = vld [vmem:[#allocation12 + $0x18] sm:$0xff]  ;;  %v664_v58 = vld [vmem:[#allocation12 + $0x10] sm:$0xff] }
  0xd4   : > { %1019 = vmatprep.subr.bf16.mxu0 %v1468_v60  ;;  %1060 = vmatprep.subr.bf16.mxu1 %v1471_v61 }
  0xd7   : > { %1020 = vmatpush1.bf16.msra.mxu0 %v1466_v62  ;;  %1061 = vmatpush1.bf16.msra.mxu1 %v1469_v0 }
  0xd8   : > { %1021 = vmatprep.subr.bf16.mxu0 %v1474_v1  ;;  %1062 = vmatprep.subr.bf16.mxu1 %v1477_v3  ;;  %v669_v3 = vld [vmem:[#allocation3 + $0x8] sm:$0xff] }
  0xdb   : > { %1022 = vmatpush1.bf16.msra.mxu0 %v1472_v4  ;;  %1063 = vmatpush1.bf16.msra.mxu1 %v1475_v5 }
 0x171   : > { %v523_v8 = vpop.f32.mrb[0].mxu0  ;;  %v564_v17 = vpop.f32.mrb[0].mxu1 }
 0x172   : > { %v524_v9 = vadd.f32 %v523_v8, %v162_v6  ;;  %v525_v10 = vpop.f32.mrb[1].mxu0  ;;  %v566_v18 = vpop.f32.mrb[1].mxu1  ;;  %v565_v24 = vadd.f32 %v564_v17, %v164_v22 }
 0x173   : > { %v526_v11 = vadd.f32 %v525_v10, %v163_v7  ;;  %v527_v12 = vpop.f32.mrb[2].mxu0  ;;  %v567_v19 = vadd.f32 %v566_v18, %v165_v16  ;;  %v568_v20 = vpop.f32.mrb[2].mxu1 }
 0x174   : > { %v1196_v13 = vmul.f32 -1.442695, %v524_v9  ;;  %v528_v14 = vpop.f32.mrb[3].mxu0  ;;  %v569_v21 = vpop.f32.mrb[3].mxu1 }
 0x175   : > { %v1197_v15 = vmul.f32 -1.442695, %v526_v11  ;;  %v1198_v23 = vmul.f32 -1.442695, %v567_v19 }
 0x176   : > { %1478 = vpow2.f32 %v1196_v13 }
 0x177   : > { %1480 = vpow2.f32 %v1197_v15 }
 0x178   : > { %1482 = vpow2.f32 %v1198_v23 }
 0x179   : > { %1484 = vtanh.f32 %v565_v24 }
 0x180   : > { %v1479_v25 = vpop.eup %1478 }
 0x181   : > { %v1481_v26 = vpop.eup %1480  ;;  %v574_v27 = vadd.f32 1.0, %v1479_v25 }
 0x182   : > { %v580_v28 = vadd.f32 1.0, %v1481_v26  ;;  %v1483_v29 = vpop.eup %1482 }
 0x183   : > { %1486 = vrcp.f32 %v574_v27  ;;  %v1485_v30 = vpop.eup %1484  ;;  %v587_v33 = vadd.f32 1.0, %v1483_v29 }
 0x184   : > { %1488 = vrcp.f32 %v580_v28 }
 0x185   : > { %1490 = vrcp.f32 %v587_v33 }
 0x18d   : > { %v1487_v32 = vpop.eup %1486 }
 0x18e   : > { %v1489_v34 = vpop.eup %1488  ;;  %v591_v35 = vmul.f32 %v1487_v32, %v1485_v30 }
 0x18f   : > { %v590_v36 = vmul.f32 %v1489_v34, %v167_v31  ;;  %v1491_v38 = vpop.eup %1490 }
 0x191   : > { %v592_v37 = vadd.f32 %v591_v35, %v590_v36 }
 0x193   : > { %1492 = vtanh.f32 %v592_v37  ;;  %596 = vst [vmem:[#allocation3] sm:$0xff] %v592_v37 }
 0x19d   : > { %v1493_v39 = vpop.eup %1492 }
 0x19e   : > { %v594_v40 = vmul.f32 %v1493_v39, %v1491_v38 }
 0x1a0   : > { %595 = vst [vmem:[#allocation2] sm:$0xff] %v594_v40  ;;  %v597_v41 = vpack.c.bf16 %v594_v40, %v594_v40 }
 0x1a2   : > { %1024 = vmatmul.mubr.bf16.vlgmr.msra.gmra.mrb[4].mxu0 %v597_v41  ;;  %1065 = vmatmul.mubr.bf16.vlgmr.msra.gmra.mrb[4].mxu1 %v597_v41 }
 0x275   : > { %v1025_v44 = vpop.f32.mrb[4].mxu0  ;;  %v1066_v45 = vpop.f32.mrb[4].mxu1 }
 0x276   : > { %v1026_v46 = vadd.f32 %v1025_v44, %v662_v42  ;;  %v1027_v47 = vpop.f32.mrb[5].mxu0  ;;  %v1068_v48 = vpop.f32.mrb[5].mxu1  ;;  %v1067_v60 = vadd.f32 %v1066_v45, %v664_v58 }
 0x277   : > { %v1028_v49 = vadd.f32 %v1027_v47, %v663_v43  ;;  %v1029_v50 = vpop.f32.mrb[6].mxu0  ;;  %v1070_v51 = vpop.f32.mrb[6].mxu1  ;;  %v1069_v57 = vadd.f32 %v1068_v48, %v665_v56 }
 0x278   : > { %v1263_v52 = vmul.f32 -1.442695, %v1026_v46  ;;  %v1030_v53 = vpop.f32.mrb[7].mxu0  ;;  %v1071_v54 = vpop.f32.mrb[7].mxu1 }
 0x279   : > { %v1264_v55 = vmul.f32 -1.442695, %v1028_v49  ;;  %v1265_v59 = vmul.f32 -1.442695, %v1069_v57 }
 0x27a   : > { %1494 = vpow2.f32 %v1263_v52 }
 0x27b   : > { %1496 = vpow2.f32 %v1264_v55 }
 0x27c   : > { %1498 = vpow2.f32 %v1265_v59 }
 0x27d   : > { %1500 = vtanh.f32 %v1067_v60 }
 0x284   : > { %v1495_v61 = vpop.eup %1494 }
 0x285   : > { %v1497_v62 = vpop.eup %1496  ;;  %v1076_v63 = vadd.f32 1.0, %v1495_v61 }
 0x286   : > { %v1082_v0 = vadd.f32 1.0, %v1497_v62  ;;  %v1499_v1 = vpop.eup %1498 }
 0x287   : > { %1502 = vrcp.f32 %v1076_v63  ;;  %v1501_v2 = vpop.eup %1500  ;;  %v1089_v7 = vadd.f32 1.0, %v1499_v1 }
 0x288   : > { %1504 = vrcp.f32 %v1082_v0 }
 0x289   : > { %1506 = vrcp.f32 %v1089_v7 }
 0x291   : > { %v1503_v4 = vpop.eup %1502 }
 0x292   : > { %v1505_v5 = vpop.eup %1504  ;;  %v1093_v6 = vmul.f32 %v1503_v4, %v1501_v2 }
 0x293   : > { %v1092_v8 = vmul.f32 %v1505_v5, %v669_v3  ;;  %v1507_v10 = vpop.eup %1506 }
 0x295   : > { %v1094_v9 = vadd.f32 %v1093_v6, %v1092_v8 }
 0x297   : > { %1508 = vtanh.f32 %v1094_v9  ;;  %1098 = vst [vmem:[#allocation3 + $0x8] sm:$0xff] %v1094_v9 }
 0x2a0   :  { %93 = sbr.rel (!%p91_p12) target bundleno = 93 (0x5d), region = 71 }
 0x2a1   : > { %v1509_v11 = vpop.eup %1508 }
 0x2a2   : > { %v1096_v12 = vmul.f32 %v1509_v11, %v1507_v10 }
 0x2a4   : > { %1097 = vst [vmem:[#allocation2 + $0x8] sm:$0xff] %v1096_v12  ;;  %v1099_v13 = vpack.c.bf16 %v1096_v12, %v1096_v12 }
 0x2a6   : > { %1102 = vst [vmem:[%s1101_s30] sm:$0xf] %v1099_v13 }
 0x2a7   :  { %1631 = shalt.err (!%p1628_p3)
}
 0x2a8   :  { %s1632_s12 = scalar_lea.hbm %s1795_s5, 576 }
 0x2a9   :  { %p1633_p4 = scmp.ne.s32.totalorder %s1795_s5, %s1632_s12  ;;  %p1636_p5 = scmp.lt.u32.totalorder %s1632_s12, %s1795_s5 }
 0x2ab   :  { %p1638_p6 = pnand %p1636_p5, %p1633_p4 }
 0x2ad   :  { %1641 = shalt.err (!%p1638_p6)
}
 0x2ae   :  { %1114 = dma.vmem_to_hbm [thread:$0]  %s1109_s7, 576, %s1795_s5, [#allocation6], %s1663_s3, %s1663_s3, %s1664_s28  }
 0x2af   :  { %1652 = dma.done.wait [#allocation6], 576  }
 0x2b0   :  { %1653 = vsyncadd [#allocation6], 4294966720 }
 0x2b1   :  { %1118 = vsyncpa [#allocation5], 1 }
 0x2b2   :  { %1119 = vsyncpa [#allocation8], 1 }
 0x2b3   :  { %1120 = vsyncpa [#allocation11], 1 }
 0x2b4   :  { %1121 = vsyncpa [#allocation6], 1 }

</bundles_post_ra>
